<compile_context>
chip_gen: v7x
topology: tpu7x:2x2x1
jax: 0.10.0
libtpu: 0.0.40
codegen_flags: <defaults>
</compile_context>

<pallas_src>
import functools
import math

import jax
import jax.numpy as jnp
from jax import lax
from jax.experimental import pallas as pl
from jax.experimental.pallas import tpu as pltpu


# ----------------------------------------------------------------------------
# Tile-size candidates.  All (8,128)-friendly; _pick() falls back to the full
# dimension when nothing divides evenly (small shapes).  Capped at sizes that
# are safe for v5e (16 MiB scoped VMEM) and v7x (64 MiB physical VMEM); v6e
# could go larger with a raised vmem_limit_bytes.
# ----------------------------------------------------------------------------
_MM_TILE_M = (256, 128, 64, 32, 16, 8)
_MM_TILE_N = (256, 128)
_MM_TILE_K = (512, 256, 128)
_ATTN_TILE_Q = (128, 64, 32, 16, 8)
_ATTN_TILE_KV = (128, 64, 32, 16, 8)

# Large finite negative for masking: avoids exp(-inf - (-inf)) = NaN hazards.
_NEG_INF = -1e30


def _pick(dim, candidates):
    for c in candidates:
        if c <= dim and dim % c == 0:
            return c
    return dim  # full dimension (always a legal block size)


# ----------------------------------------------------------------------------
# Kernel 1: fused QKV projection.  One x tile -> three MXU matmuls, three
# outputs.  x is read from HBM once per grid step (instead of three times).
# ----------------------------------------------------------------------------
def _qkv_bias_kernel(x_ref, wq_ref, wk_ref, wv_ref, bq_ref, bk_ref, bv_ref,
                     oq_ref, ok_ref, ov_ref, accq, acck, accv):
    @pl.when(pl.program_id(2) == 0)
    def _():
        accq[...] = jnp.zeros_like(accq)
        acck[...] = jnp.zeros_like(acck)
        accv[...] = jnp.zeros_like(accv)

    x = x_ref[...]
    accq[...] += jnp.dot(x, wq_ref[...], preferred_element_type=jnp.float32)
    acck[...] += jnp.dot(x, wk_ref[...], preferred_element_type=jnp.float32)
    accv[...] += jnp.dot(x, wv_ref[...], preferred_element_type=jnp.float32)

    @pl.when(pl.program_id(2) == pl.num_programs(2) - 1)
    def _():
        oq_ref[...] = (accq[...] + bq_ref[...]).astype(oq_ref.dtype)
        ok_ref[...] = (acck[...] + bk_ref[...]).astype(ok_ref.dtype)
        ov_ref[...] = (accv[...] + bv_ref[...]).astype(ov_ref.dtype)


def _qkv_nobias_kernel(x_ref, wq_ref, wk_ref, wv_ref,
                       oq_ref, ok_ref, ov_ref, accq, acck, accv):
    @pl.when(pl.program_id(2) == 0)
    def _():
        accq[...] = jnp.zeros_like(accq)
        acck[...] = jnp.zeros_like(acck)
        accv[...] = jnp.zeros_like(accv)

    x = x_ref[...]
    accq[...] += jnp.dot(x, wq_ref[...], preferred_element_type=jnp.float32)
    acck[...] += jnp.dot(x, wk_ref[...], preferred_element_type=jnp.float32)
    accv[...] += jnp.dot(x, wv_ref[...], preferred_element_type=jnp.float32)

    @pl.when(pl.program_id(2) == pl.num_programs(2) - 1)
    def _():
        oq_ref[...] = accq[...].astype(oq_ref.dtype)
        ok_ref[...] = acck[...].astype(ok_ref.dtype)
        ov_ref[...] = accv[...].astype(ov_ref.dtype)


def qkv_proj(x2d, wq, wk, wv, bq=None, bk=None, bv=None, *,
             out_dtype=jnp.bfloat16):
    """x2d: (M, K) bf16; w*: (K, N) bf16; b*: (1, N) f32 or None -> 3x (M, N)."""
    M, K = x2d.shape
    K2, N = wq.shape
    assert K == K2 and wk.shape == wq.shape and wv.shape == wq.shape

    tm = _pick(M, _MM_TILE_M)
    tn = _pick(N, _MM_TILE_N)
    tk = _pick(K, _MM_TILE_K)
    grid = (M // tm, N // tn, K // tk)

    x_spec = pl.BlockSpec((tm, tk), lambda i, j, k: (i, k))
    w_spec = pl.BlockSpec((tk, tn), lambda i, j, k: (k, j))
    b_spec = pl.BlockSpec((1, tn), lambda i, j, k: (0, j))
    o_spec = pl.BlockSpec((tm, tn), lambda i, j, k: (i, j))

    has_bias = bq is not None
    if has_bias:
        kernel = _qkv_bias_kernel
        in_specs = [x_spec, w_spec, w_spec, w_spec, b_spec, b_spec, b_spec]
        operands = (x2d, wq, wk, wv, bq, bk, bv)
    else:
        kernel = _qkv_nobias_kernel  # skip the zero-bias DMA + add
        in_specs = [x_spec, w_spec, w_spec, w_spec]
        operands = (x2d, wq, wk, wv)

    out_shape = tuple(jax.ShapeDtypeStruct((M, N), out_dtype) for _ in range(3))

    return pl.pallas_call(
        kernel,
        out_shape=out_shape,
        grid_spec=pltpu.PrefetchScalarGridSpec(
            num_scalar_prefetch=0,
            grid=grid,
            in_specs=in_specs,
            out_specs=[o_spec, o_spec, o_spec],
            scratch_shapes=[pltpu.VMEM((tm, tn), jnp.float32)] * 3,
        ),
        compiler_params=pltpu.CompilerParams(
            dimension_semantics=("parallel", "parallel", "arbitrary")),
    )(*operands)


# ----------------------------------------------------------------------------
# Kernel 2: tiled dense layer  y = x @ W + b   (output projection)
# ----------------------------------------------------------------------------
def _linear_bias_kernel(x_ref, w_ref, b_ref, o_ref, acc_ref):
    @pl.when(pl.program_id(2) == 0)
    def _():
        acc_ref[...] = jnp.zeros_like(acc_ref)

    acc_ref[...] += jnp.dot(x_ref[...], w_ref[...],
                            preferred_element_type=jnp.float32)

    @pl.when(pl.program_id(2) == pl.num_programs(2) - 1)
    def _():
        o_ref[...] = (acc_ref[...] + b_ref[...]).astype(o_ref.dtype)


def linear(x2d, w, b, *, out_dtype=None):
    """x2d: (M, K) bf16, w: (K, N) bf16, b: (1, N) f32 -> (M, N)."""
    M, K = x2d.shape
    K2, N = w.shape
    assert K == K2
    out_dtype = out_dtype if out_dtype is not None else x2d.dtype

    tm = _pick(M, _MM_TILE_M)
    tn = _pick(N, _MM_TILE_N)
    tk = _pick(K, _MM_TILE_K)
    grid = (M // tm, N // tn, K // tk)

    return pl.pallas_call(
        _linear_bias_kernel,
        out_shape=jax.ShapeDtypeStruct((M, N), out_dtype),
        grid_spec=pltpu.PrefetchScalarGridSpec(
            num_scalar_prefetch=0,
            grid=grid,
            in_specs=[
                pl.BlockSpec((tm, tk), lambda i, j, k: (i, k)),
                pl.BlockSpec((tk, tn), lambda i, j, k: (k, j)),
                pl.BlockSpec((1, tn), lambda i, j, k: (0, j)),
            ],
            out_specs=pl.BlockSpec((tm, tn), lambda i, j, k: (i, j)),
            scratch_shapes=[pltpu.VMEM((tm, tn), jnp.float32)],
        ),
        compiler_params=pltpu.CompilerParams(
            dimension_semantics=("parallel", "parallel", "arbitrary")),
    )(x2d, w, b)


# ----------------------------------------------------------------------------
# Kernel 3: flash causal multi-head attention.
#   Inputs  q, k, v : (B, T, H*hd)  (lane-dense, token-major; q pre-scaled)
#   Output  ctx     : (B, T, H*hd)
# Grid: (B, T//block_q, T//block_kv); heads split in-register (static unroll).
# ----------------------------------------------------------------------------
def _attn_step(q, k, v, m_ref, l_ref, acc_ref, *, num_heads, head_dim, mask):
    """One online-softmax update.  mask=None -> unmasked fast path.

    Per-head m/l/acc columns are built in registers and the scratch refs are
    written once per step with full-width (lane-dense) stores.
    """
    m_prev = m_ref[...]      # (bq, H)  f32
    l_prev = l_ref[...]      # (bq, H)  f32
    acc_prev = acc_ref[...]  # (bq, D)  f32

    m_cols, l_cols, acc_cols = [], [], []
    for h in range(num_heads):              # static unroll; static lane slices
        sl = slice(h * head_dim, (h + 1) * head_dim)

        # scores: contract last dims directly (no k.T relayout), f32 acc.
        # Scale already folded into W_q at init (zero runtime cost).
        s = lax.dot_general(q[:, sl], k[:, sl],
                            (((1,), (1,)), ((), ())),
                            preferred_element_type=jnp.float32)
        if mask is not None:
            s = jnp.where(mask, s, _NEG_INF)

        m_prev_h = m_prev[:, h:h + 1]                              # (bq, 1)
        m_new_h = jnp.maximum(m_prev_h, jnp.max(s, axis=-1, keepdims=True))
        alpha_h = jnp.exp(m_prev_h - m_new_h)                      # (bq, 1)
        p = jnp.exp(s - m_new_h)                                   # (bq, bkv)

        l_cols.append(alpha_h * l_prev[:, h:h + 1]
                      + jnp.sum(p, axis=-1, keepdims=True))
        acc_cols.append(alpha_h * acc_prev[:, sl]
                        + jnp.dot(p.astype(v.dtype), v[:, sl],
                                  preferred_element_type=jnp.float32))
        m_cols.append(m_new_h)

    m_ref[...] = jnp.concatenate(m_cols, axis=-1)
    l_ref[...] = jnp.concatenate(l_cols, axis=-1)
    acc_ref[...] = jnp.concatenate(acc_cols, axis=-1)


def _flash_attn_kernel(q_ref, k_ref, v_ref, o_ref, m_ref, l_ref, acc_ref,
                       *, num_heads, head_dim, block_q, block_kv):
    qi = pl.program_id(1)
    kv = pl.program_id(2)

    @pl.when(kv == 0)
    def _init():
        m_ref[...] = jnp.full_like(m_ref, _NEG_INF)
        l_ref[...] = jnp.zeros_like(l_ref)
        acc_ref[...] = jnp.zeros_like(acc_ref)

    first_row = qi * block_q
    last_row = (qi + 1) * block_q - 1
    first_col = kv * block_kv
    last_col = (kv + 1) * block_kv - 1

    needs_work = first_col <= last_row        # causal block skip
    fully_unmasked = last_col <= first_row    # strictly at/below the diagonal

    @pl.when(jnp.logical_and(needs_work, fully_unmasked))
    def _unmasked():
        _attn_step(q_ref[0], k_ref[0], v_ref[0], m_ref, l_ref, acc_ref,
                   num_heads=num_heads, head_dim=head_dim, mask=None)

    @pl.when(jnp.logical_and(needs_work, jnp.logical_not(fully_unmasked)))
    def _masked():
        row = first_row + lax.broadcasted_iota(
            jnp.int32, (block_q, block_kv), 0)
        col = first_col + lax.broadcasted_iota(
            jnp.int32, (block_q, block_kv), 1)
        _attn_step(q_ref[0], k_ref[0], v_ref[0], m_ref, l_ref, acc_ref,
                   num_heads=num_heads, head_dim=head_dim, mask=row >= col)

    @pl.when(kv == pl.num_programs(2) - 1)
    def _finalize():
        # Deferred softmax normalization; one lane-dense full-width store.
        inv_l = pl.reciprocal(l_ref[...], approx=True)   # (bq, H)
        acc = acc_ref[...]
        cols = []
        for h in range(num_heads):
            sl = slice(h * head_dim, (h + 1) * head_dim)
            cols.append(acc[:, sl] * inv_l[:, h:h + 1])
        o_ref[0] = jnp.concatenate(cols, axis=-1).astype(o_ref.dtype)


def flash_causal_mha(q, k, v, *, num_heads, block_q=None, block_kv=None):
    """q, k, v: (B, T, H*hd) -> (B, T, H*hd); q is expected pre-scaled."""
    B, T, D = q.shape
    assert D % num_heads == 0
    head_dim = D // num_heads
    block_q = block_q if block_q is not None else _pick(T, _ATTN_TILE_Q)
    block_kv = block_kv if block_kv is not None else _pick(T, _ATTN_TILE_KV)
    assert T % block_q == 0 and T % block_kv == 0

    kernel = functools.partial(
        _flash_attn_kernel, num_heads=num_heads, head_dim=head_dim,
        block_q=block_q, block_kv=block_kv)

    def q_index(b, i, j):
        return (b, i, 0)

    def kv_index(b, i, j):
        # Clamp skipped (fully-masked) kv steps to the last causally-needed
        # block: the index repeats, so Pallas elides the redundant K/V DMA.
        last_needed = ((i + 1) * block_q - 1) // block_kv
        return (b, jnp.minimum(j, last_needed), 0)

    q_spec = pl.BlockSpec((1, block_q, D), q_index)
    kv_spec = pl.BlockSpec((1, block_kv, D), kv_index)
    o_spec = pl.BlockSpec((1, block_q, D), q_index)

    return pl.pallas_call(
        kernel,
        out_shape=jax.ShapeDtypeStruct((B, T, D), q.dtype),
        grid_spec=pltpu.PrefetchScalarGridSpec(
            num_scalar_prefetch=0,
            grid=(B, T // block_q, T // block_kv),
            in_specs=[q_spec, kv_spec, kv_spec],
            out_specs=o_spec,
            scratch_shapes=[
                pltpu.VMEM((block_q, num_heads), jnp.float32),  # running max
                pltpu.VMEM((block_q, num_heads), jnp.float32),  # running sum
                pltpu.VMEM((block_q, D), jnp.float32),          # output acc
            ],
        ),
        compiler_params=pltpu.CompilerParams(
            dimension_semantics=("parallel", "parallel", "arbitrary")),
    )(q, k, v)


# ----------------------------------------------------------------------------
# Module wrapper (glue in plain JAX; hot paths in Pallas)
# ----------------------------------------------------------------------------
class MultiHeadAttentionPallas:
    def __init__(self, d_in, d_out, context_length, dropout, num_heads,
                 qkv_bias=False, key=None,
                 attn_block_q=None, attn_block_kv=None):
        assert d_out % num_heads == 0, "d_out must be divisible by num_heads"
        self.d_in = d_in
        self.d_out = d_out
        self.num_heads = num_heads
        self.head_dim = d_out // num_heads
        self.context_length = context_length
        self.qkv_bias = qkv_bias
        self.attn_block_q = attn_block_q
        self.attn_block_kv = attn_block_kv
        # TODO(synk): dropout on attention weights not applied (eval-mode semantics).
        self.dropout = dropout

        key = key if key is not None else jax.random.PRNGKey(0)
        kq, kk, kv, ko, kbq, kbk, kbv, kbo = jax.random.split(key, 8)
        s_in = 1.0 / math.sqrt(d_in)
        s_out = 1.0 / math.sqrt(d_out)

        def uni(k, shape, s):
            return jax.random.uniform(k, shape, jnp.float32, -s, s)

        # Master weights (bf16, transposed (in, out)); reference upcasts these.
        self.w_q = uni(kq, (d_in, d_out), s_in).astype(jnp.bfloat16)
        self.w_k = uni(kk, (d_in, d_out), s_in).astype(jnp.bfloat16)
        self.w_v = uni(kv, (d_in, d_out), s_in).astype(jnp.bfloat16)
        self.w_o = uni(ko, (d_out, d_out), s_out).astype(jnp.bfloat16)
        if qkv_bias:
            self.b_q = uni(kbq, (1, d_out), s_in)
            self.b_k = uni(kbk, (1, d_out), s_in)
            self.b_v = uni(kbv, (1, d_out), s_in)
        else:
            self.b_q = self.b_k = self.b_v = None
        self.b_o = uni(kbo, (1, d_out), s_out)

        # Kernel-side copies: 1/sqrt(head_dim) folded into W_q (and b_q) so no
        # per-element score scaling is needed inside the attention kernel.
        scale = 1.0 / math.sqrt(self.head_dim)
        self._wq = (self.w_q.astype(jnp.float32) * scale).astype(jnp.bfloat16)
        self._wk = self.w_k
        self._wv = self.w_v
        self._wo = self.w_o
        self._bq = None if self.b_q is None else self.b_q * scale
        self._bk = self.b_k
        self._bv = self.b_v
        self._bo = self.b_o

    def __call__(self, x):
        B, T, _ = x.shape
        xb = x.astype(jnp.bfloat16).reshape(B * T, self.d_in)

        # Fused QKV projection: one x read feeds three MXU matmuls.
        q, k, v = qkv_proj(xb, self._wq, self._wk, self._wv,
                           self._bq, self._bk, self._bv,
                           out_dtype=jnp.bfloat16)

        # Lane-dense (B, T, H*hd) layout all the way — no head transposes.
        q = q.reshape(B, T, self.d_out)
        k = k.reshape(B, T, self.d_out)
        v = v.reshape(B, T, self.d_out)

        ctx = flash_causal_mha(q, k, v, num_heads=self.num_heads,
                               block_q=self.attn_block_q,
                               block_kv=self.attn_block_kv)

        out = linear(ctx.reshape(B * T, self.d_out), self._wo, self._bo,
                     out_dtype=jnp.float32)
        return out.reshape(B, T, self.d_out)


# ----------------------------------------------------------------------------
# Pure-JAX f32 reference (mirrors the PyTorch forward in eval mode)
# ----------------------------------------------------------------------------
def reference_forward(mod, x):
    B, T, _ = x.shape
    H, hd = mod.num_heads, mod.head_dim
    wq = mod.w_q.astype(jnp.float32)
    wk = mod.w_k.astype(jnp.float32)
    wv = mod.w_v.astype(jnp.float32)
    wo = mod.w_o.astype(jnp.float32)

    def lin(z, w, b):
        y = z @ w
        return y if b is None else y + b

    q = lin(x, wq, mod.b_q).reshape(B, T, H, hd).transpose(0, 2, 1, 3)
    k = lin(x, wk, mod.b_k).reshape(B, T, H, hd).transpose(0, 2, 1, 3)
    v = lin(x, wv, mod.b_v).reshape(B, T, H, hd).transpose(0, 2, 1, 3)

    s = jnp.einsum("bhqd,bhkd->bhqk", q, k) / math.sqrt(hd)
    mask = jnp.tril(jnp.ones((T, T), bool))
    s = jnp.where(mask, s, -jnp.inf)
    p = jax.nn.softmax(s, axis=-1)
    ctx = jnp.einsum("bhqk,bhkd->bhqd", p, v)
    ctx = ctx.transpose(0, 2, 1, 3).reshape(B, T, mod.d_out)
    return ctx @ wo + mod.b_o


if __name__ == "__main__":
    # Small deterministic test; attn blocks of 8 exercise the multi-KV-tile
    # online-softmax path, the causal block skip, the clamped KV index_map and
    # the masked/unmasked compute split.  Both bias modes are checked.
    B, T = 2, 16
    d_in, d_out, num_heads = 32, 32, 4
    x = jax.random.normal(jax.random.PRNGKey(0), (B, T, d_in), jnp.float32)

    for qkv_bias in (False, True):
        mod = MultiHeadAttentionPallas(
            d_in=d_in, d_out=d_out, context_length=T, dropout=0.0,
            num_heads=num_heads, qkv_bias=qkv_bias, key=jax.random.PRNGKey(0),
            attn_block_q=8, attn_block_kv=8)

        out = jax.block_until_ready(mod(x))
        ref = reference_forward(mod, x)

        assert out.shape == (B, T, d_out)
        max_err = float(jnp.max(jnp.abs(out - ref)))
        assert jnp.allclose(out, ref, atol=5e-2, rtol=5e-2), (
            f"mismatch vs reference (qkv_bias={qkv_bias}), "
            f"max abs err = {max_err}")

    print("KERNEL_OK")
</pallas_src>

<mosaic_0001>
module attributes {stable_mosaic.version = 11 : i64} {
  func.func @_qkv_nobias_kernel(%arg0: i32, %arg1: i32, %arg2: i32, %arg3: memref<32x32xbf16, #tpu.memory_space<vmem>>, %arg4: memref<32x32xbf16, #tpu.memory_space<vmem>>, %arg5: memref<32x32xbf16, #tpu.memory_space<vmem>>, %arg6: memref<32x32xbf16, #tpu.memory_space<vmem>>, %arg7: memref<32x32xbf16, #tpu.memory_space<vmem>>, %arg8: memref<32x32xbf16, #tpu.memory_space<vmem>>, %arg9: memref<32x32xbf16, #tpu.memory_space<vmem>>, %arg10: memref<32x32xf32, #tpu.memory_space<vmem>>, %arg11: memref<32x32xf32, #tpu.memory_space<vmem>>, %arg12: memref<32x32xf32, #tpu.memory_space<vmem>>) attributes {dimension_semantics = [#tpu.dimension_semantics<parallel>, #tpu.dimension_semantics<parallel>, #tpu.dimension_semantics<arbitrary>], iteration_bounds = array<i64: 1, 1, 1>, scalar_prefetch = 0 : i64, scratch_operands = 3 : i64, tpu.core_type = #tpu.core_type<tc>, window_params = [{transform_indices = @transform_0, window_bounds = array<i64: 32, 32>}, {transform_indices = @transform_1, window_bounds = array<i64: 32, 32>}, {transform_indices = @transform_2, window_bounds = array<i64: 32, 32>}, {transform_indices = @transform_3, window_bounds = array<i64: 32, 32>}, {transform_indices = @transform_4, window_bounds = array<i64: 32, 32>}, {transform_indices = @transform_5, window_bounds = array<i64: 32, 32>}, {transform_indices = @transform_6, window_bounds = array<i64: 32, 32>}]} {
    %c0_i32 = arith.constant 0 : i32
    %0 = arith.cmpi eq, %arg2, %c0_i32 : i32
    %1 = arith.extui %0 : i1 to i32
    %c0_i32_0 = arith.constant 0 : i32
    %2 = arith.cmpi ne, %1, %c0_i32_0 : i32
    scf.if %2 {
      %cst_24 = arith.constant 0.000000e+00 : f32
      %22 = vector.broadcast %cst_24 : f32 to vector<32x32xf32>
      %c0_25 = arith.constant 0 : index
      %c0_26 = arith.constant 0 : index
      %23 = vector.load %arg10[%c0_25, %c0_26] : memref<32x32xf32, #tpu.memory_space<vmem>>, vector<32x32xf32>
      tpu.vector_store %arg10[%c0_25, %c0_26], %22 {strides = array<i32>} : memref<32x32xf32, #tpu.memory_space<vmem>>, vector<32x32xf32>,
      %cst_27 = arith.constant 0.000000e+00 : f32
      %24 = vector.broadcast %cst_27 : f32 to vector<32x32xf32>
      %c0_28 = arith.constant 0 : index
      %c0_29 = arith.constant 0 : index
      %25 = vector.load %arg11[%c0_28, %c0_29] : memref<32x32xf32, #tpu.memory_space<vmem>>, vector<32x32xf32>
      tpu.vector_store %arg11[%c0_28, %c0_29], %24 {strides = array<i32>} : memref<32x32xf32, #tpu.memory_space<vmem>>, vector<32x32xf32>,
      %cst_30 = arith.constant 0.000000e+00 : f32
      %26 = vector.broadcast %cst_30 : f32 to vector<32x32xf32>
      %c0_31 = arith.constant 0 : index
      %c0_32 = arith.constant 0 : index
      %27 = vector.load %arg12[%c0_31, %c0_32] : memref<32x32xf32, #tpu.memory_space<vmem>>, vector<32x32xf32>
      tpu.vector_store %arg12[%c0_31, %c0_32], %26 {strides = array<i32>} : memref<32x32xf32, #tpu.memory_space<vmem>>, vector<32x32xf32>,
    } else {
    }
    %c0 = arith.constant 0 : index
    %c0_1 = arith.constant 0 : index
    %3 = vector.load %arg3[%c0, %c0_1] : memref<32x32xbf16, #tpu.memory_space<vmem>>, vector<32x32xbf16>
    %c0_2 = arith.constant 0 : index
    %c0_3 = arith.constant 0 : index
    %4 = vector.load %arg10[%c0_2, %c0_3] : memref<32x32xf32, #tpu.memory_space<vmem>>, vector<32x32xf32>
    %c0_4 = arith.constant 0 : index
    %c0_5 = arith.constant 0 : index
    %5 = vector.load %arg4[%c0_4, %c0_5] : memref<32x32xbf16, #tpu.memory_space<vmem>>, vector<32x32xbf16>
    %cst = arith.constant dense<0.000000e+00> : vector<32x32xf32>
    %6 = tpu.matmul %3, %5, %cst {dimension_numbers = #tpu.dot_dimension_numbers<[1], [0], [0], [1], [0, 0, 1, 1], [], []>} : vector<32x32xbf16>, vector<32x32xbf16>, vector<32x32xf32> -> vector<32x32xf32>
    %7 = arith.addf %4, %6 : vector<32x32xf32>
    %c0_6 = arith.constant 0 : index
    %c0_7 = arith.constant 0 : index
    %8 = vector.load %arg10[%c0_6, %c0_7] : memref<32x32xf32, #tpu.memory_space<vmem>>, vector<32x32xf32>
    tpu.vector_store %arg10[%c0_6, %c0_7], %7 {strides = array<i32>} : memref<32x32xf32, #tpu.memory_space<vmem>>, vector<32x32xf32>,
    %c0_8 = arith.constant 0 : index
    %c0_9 = arith.constant 0 : index
    %9 = vector.load %arg11[%c0_8, %c0_9] : memref<32x32xf32, #tpu.memory_space<vmem>>, vector<32x32xf32>
    %c0_10 = arith.constant 0 : index
    %c0_11 = arith.constant 0 : index
    %10 = vector.load %arg5[%c0_10, %c0_11] : memref<32x32xbf16, #tpu.memory_space<vmem>>, vector<32x32xbf16>
    %cst_12 = arith.constant dense<0.000000e+00> : vector<32x32xf32>
    %11 = tpu.matmul %3, %10, %cst_12 {dimension_numbers = #tpu.dot_dimension_numbers<[1], [0], [0], [1], [0, 0, 1, 1], [], []>} : vector<32x32xbf16>, vector<32x32xbf16>, vector<32x32xf32> -> vector<32x32xf32>
    %12 = arith.addf %9, %11 : vector<32x32xf32>
    %c0_13 = arith.constant 0 : index
    %c0_14 = arith.constant 0 : index
    %13 = vector.load %arg11[%c0_13, %c0_14] : memref<32x32xf32, #tpu.memory_space<vmem>>, vector<32x32xf32>
    tpu.vector_store %arg11[%c0_13, %c0_14], %12 {strides = array<i32>} : memref<32x32xf32, #tpu.memory_space<vmem>>, vector<32x32xf32>,
    %c0_15 = arith.constant 0 : index
    %c0_16 = arith.constant 0 : index
    %14 = vector.load %arg12[%c0_15, %c0_16] : memref<32x32xf32, #tpu.memory_space<vmem>>, vector<32x32xf32>
    %c0_17 = arith.constant 0 : index
    %c0_18 = arith.constant 0 : index
    %15 = vector.load %arg6[%c0_17, %c0_18] : memref<32x32xbf16, #tpu.memory_space<vmem>>, vector<32x32xbf16>
    %cst_19 = arith.constant dense<0.000000e+00> : vector<32x32xf32>
    %16 = tpu.matmul %3, %15, %cst_19 {dimension_numbers = #tpu.dot_dimension_numbers<[1], [0], [0], [1], [0, 0, 1, 1], [], []>} : vector<32x32xbf16>, vector<32x32xbf16>, vector<32x32xf32> -> vector<32x32xf32>
    %17 = arith.addf %14, %16 : vector<32x32xf32>
    %c0_20 = arith.constant 0 : index
    %c0_21 = arith.constant 0 : index
    %18 = vector.load %arg12[%c0_20, %c0_21] : memref<32x32xf32, #tpu.memory_space<vmem>>, vector<32x32xf32>
    tpu.vector_store %arg12[%c0_20, %c0_21], %17 {strides = array<i32>} : memref<32x32xf32, #tpu.memory_space<vmem>>, vector<32x32xf32>,
    %c0_i32_22 = arith.constant 0 : i32
    %19 = arith.cmpi eq, %arg2, %c0_i32_22 : i32
    %20 = arith.extui %19 : i1 to i32
    %c0_i32_23 = arith.constant 0 : i32
    %21 = arith.cmpi ne, %20, %c0_i32_23 : i32
    scf.if %21 {
      %c0_24 = arith.constant 0 : index
      %c0_25 = arith.constant 0 : index
      %22 = vector.load %arg10[%c0_24, %c0_25] : memref<32x32xf32, #tpu.memory_space<vmem>>, vector<32x32xf32>
      %23 = arith.truncf %22 : vector<32x32xf32> to vector<32x32xbf16>
      %c0_26 = arith.constant 0 : index
      %c0_27 = arith.constant 0 : index
      %24 = vector.load %arg7[%c0_26, %c0_27] : memref<32x32xbf16, #tpu.memory_space<vmem>>, vector<32x32xbf16>
      tpu.vector_store %arg7[%c0_26, %c0_27], %23 {strides = array<i32>} : memref<32x32xbf16, #tpu.memory_space<vmem>>, vector<32x32xbf16>,
      %c0_28 = arith.constant 0 : index
      %c0_29 = arith.constant 0 : index
      %25 = vector.load %arg11[%c0_28, %c0_29] : memref<32x32xf32, #tpu.memory_space<vmem>>, vector<32x32xf32>
      %26 = arith.truncf %25 : vector<32x32xf32> to vector<32x32xbf16>
      %c0_30 = arith.constant 0 : index
      %c0_31 = arith.constant 0 : index
      %27 = vector.load %arg8[%c0_30, %c0_31] : memref<32x32xbf16, #tpu.memory_space<vmem>>, vector<32x32xbf16>
      tpu.vector_store %arg8[%c0_30, %c0_31], %26 {strides = array<i32>} : memref<32x32xbf16, #tpu.memory_space<vmem>>, vector<32x32xbf16>,
      %c0_32 = arith.constant 0 : index
      %c0_33 = arith.constant 0 : index
      %28 = vector.load %arg12[%c0_32, %c0_33] : memref<32x32xf32, #tpu.memory_space<vmem>>, vector<32x32xf32>
      %29 = arith.truncf %28 : vector<32x32xf32> to vector<32x32xbf16>
      %c0_34 = arith.constant 0 : index
      %c0_35 = arith.constant 0 : index
      %30 = vector.load %arg9[%c0_34, %c0_35] : memref<32x32xbf16, #tpu.memory_space<vmem>>, vector<32x32xbf16>
      tpu.vector_store %arg9[%c0_34, %c0_35], %29 {strides = array<i32>} : memref<32x32xbf16, #tpu.memory_space<vmem>>, vector<32x32xbf16>,
    } else {
    }
    return
  }
  func.func @transform_0(%arg0: i32, %arg1: i32, %arg2: i32) -> (i32, i32) {
    %c0_i32 = arith.constant 0 : i32
    return %arg0, %arg2 : i32, i32
  }
  func.func @transform_1(%arg0: i32, %arg1: i32, %arg2: i32) -> (i32, i32) {
    %c0_i32 = arith.constant 0 : i32
    return %arg2, %arg1 : i32, i32
  }
  func.func @transform_2(%arg0: i32, %arg1: i32, %arg2: i32) -> (i32, i32) {
    %c0_i32 = arith.constant 0 : i32
    return %arg2, %arg1 : i32, i32
  }
  func.func @transform_3(%arg0: i32, %arg1: i32, %arg2: i32) -> (i32, i32) {
    %c0_i32 = arith.constant 0 : i32
    return %arg2, %arg1 : i32, i32
  }
  func.func @transform_4(%arg0: i32, %arg1: i32, %arg2: i32) -> (i32, i32) {
    %c0_i32 = arith.constant 0 : i32
    return %arg0, %arg1 : i32, i32
  }
  func.func @transform_5(%arg0: i32, %arg1: i32, %arg2: i32) -> (i32, i32) {
    %c0_i32 = arith.constant 0 : i32
    return %arg0, %arg1 : i32, i32
  }
  func.func @transform_6(%arg0: i32, %arg1: i32, %arg2: i32) -> (i32, i32) {
    %c0_i32 = arith.constant 0 : i32
    return %arg0, %arg1 : i32, i32
  }
}

</mosaic_0001>

<bundles_post_ra>
// kernel: tpu_custom_call.1
= control target key start
LH: loop header
LB: loop body
LE: loop exit
PB: predicated region body
PF: predicated region fallthrough
CT: control target
= control target key end

     0   :  { %12 = vsyncpa [#allocation6], 0  ;;  %s942_s0 = inlined_call_operand.hbm [shape: bf16[32,32], index: 0, kind: input, shape index: {}]   ;;  %s943_s1 = inlined_call_operand.hbm [shape: bf16[32,32], index: 1, kind: input, shape index: {}]   ;;  %s944_s2 = inlined_call_operand.hbm [shape: bf16[32,32], index: 2, kind: input, shape index: {}]   ;;  %s945_s3 = inlined_call_operand.hbm [shape: bf16[32,32], index: 3, kind: input, shape index: {}]   ;;  %s946_s4 = inlined_call_operand.hbm [shape: bf16[32,32], index: 4, kind: output, shape index: {0}]   ;;  %s947_s5 = inlined_call_operand.hbm [shape: bf16[32,32], index: 5, kind: output, shape index: {1}]   ;;  %s948_s6 = inlined_call_operand.hbm [shape: bf16[32,32], index: 6, kind: output, shape index: {2}]  }
   0x1   :  { %13 = vsyncpa [#allocation9], 0 }
   0x2   :  { %14 = vsyncpa [#allocation12], 0 }
   0x3   :  { %15 = vsyncpa [#allocation7], 0 }
   0x4   :  { %16 = vsyncpa [#allocation15], 0  ;;  %s729_s21 = smov [#allocation8]   ;;  %s730_s23 = smov [#allocation5]  }
   0x5   :  { %s34_s22 = sshll.u32 %s729_s21, 4  ;;  %s22_s24 = sshll.u32 %s730_s23, 4  ;;  %s35_s22 = int_to_ptr.vmem [resolvable:$true] %s34_s22  ;;  %s774_s24 = int_to_ptr.vmem [resolvable:$true] %s22_s24 }
   0x6   :  { %s565_s27 = scalar_lea.hbm %s943_s1, 256 }
   0x7   :  { %p566_p0 = scmp.ne.s32.totalorder %s943_s1, %s565_s27  ;;  %p569_p1 = scmp.lt.u32.totalorder %s565_s27, %s943_s1 }
   0x9   :  { %p571_p2 = pnand %p569_p1, %p566_p0 }
   0xb   :  { %574 = shalt.err (!%p571_p2)
}
   0xc   :  { %s575_s8 = scalar_lea.vmem %s35_s22, 256  ;;  %p580_p4 = scmp.lt.s32.totalorder %s35_s22, %s35_s22 }
   0xd   :  { %p576_p3 = scmp.ne.s32.totalorder %s35_s22, %s575_s8  ;;  %p581_p5 = scmp.lt.s32.totalorder %s575_s8, %s575_s8 }
   0xf   :  { %p582_p6 = por %p581_p5, %p580_p4 }
  0x11   :  { %p583_p7 = pnand %p582_p6, %p576_p3 }
  0x13   :  { %586 = shalt.err (!%p583_p7)
}
  0x14   :  { %s731_s9 = smov 64   ;;  %s732_s10 = smov 4  }
  0x15   :  { %40 = dma.hbm_to_vmem [thread:$0]  %s943_s1, 256, %s35_s22, [#allocation9], %s731_s9, %s731_s9, %s732_s10  }
  0x16   :  { %s587_s15 = scalar_lea.hbm %s942_s0, 256 }
  0x17   :  { %p588_p8 = scmp.ne.s32.totalorder %s942_s0, %s587_s15  ;;  %p591_p9 = scmp.lt.u32.totalorder %s587_s15, %s942_s0 }
  0x19   :  { %p593_p10 = pnand %p591_p9, %p588_p8 }
  0x1b   :  { %596 = shalt.err (!%p593_p10)
}
  0x1c   :  { %s597_s20 = scalar_lea.vmem %s774_s24, 256  ;;  %p602_p12 = scmp.lt.s32.totalorder %s774_s24, %s774_s24 }
  0x1d   :  { %p598_p11 = scmp.ne.s32.totalorder %s774_s24, %s597_s20  ;;  %p603_p13 = scmp.lt.s32.totalorder %s597_s20, %s597_s20 }
  0x1f   :  { %p604_p0 = por %p603_p13, %p602_p12 }
  0x21   :  { %p605_p1 = pnand %p604_p0, %p598_p11 }
  0x23   :  { %608 = shalt.err (!%p605_p1)
}
  0x24   :  { %28 = dma.hbm_to_vmem [thread:$0]  %s942_s0, 256, %s774_s24, [#allocation6], %s731_s9, %s731_s9, %s732_s10  }
  0x25   :  { %s733_s22 = smov [#allocation10]   ;;  %s734_s25 = smov [#allocation11]  }
  0x26   :  { %s46_s23 = sshll.u32 %s733_s22, 4  ;;  %s58_s26 = sshll.u32 %s734_s25, 4  ;;  %s47_s23 = int_to_ptr.vmem [resolvable:$true] %s46_s23  ;;  %s811_s26 = int_to_ptr.vmem [resolvable:$true] %s58_s26 }
  0x27   :  { %s609_s29 = scalar_lea.hbm %s944_s2, 256 }
  0x28   :  { %p610_p2 = scmp.ne.s32.totalorder %s944_s2, %s609_s29  ;;  %p613_p3 = scmp.lt.u32.totalorder %s609_s29, %s944_s2 }
  0x2a   :  { %p615_p4 = pnand %p613_p3, %p610_p2 }
  0x2c   :  { %618 = shalt.err (!%p615_p4)
}
  0x2d   :  { %s619_s0 = scalar_lea.vmem %s47_s23, 256  ;;  %p624_p6 = scmp.lt.s32.totalorder %s47_s23, %s47_s23 }
  0x2e   :  { %p620_p5 = scmp.ne.s32.totalorder %s47_s23, %s619_s0  ;;  %p625_p7 = scmp.lt.s32.totalorder %s619_s0, %s619_s0 }
  0x30   :  { %p626_p8 = por %p625_p7, %p624_p6 }
  0x32   :  { %p627_p9 = pnand %p626_p8, %p620_p5 }
  0x34   :  { %630 = shalt.err (!%p627_p9)
}
  0x35   :  { %52 = dma.hbm_to_vmem [thread:$0]  %s944_s2, 256, %s47_s23, [#allocation9], %s731_s9, %s731_s9, %s732_s10  }
  0x36   :  { %s631_s15 = scalar_lea.hbm %s945_s3, 256 }
  0x37   :  { %p632_p10 = scmp.ne.s32.totalorder %s945_s3, %s631_s15  ;;  %p635_p11 = scmp.lt.u32.totalorder %s631_s15, %s945_s3 }
  0x39   :  { %p637_p12 = pnand %p635_p11, %p632_p10 }
  0x3b   :  { %640 = shalt.err (!%p637_p12)
}
  0x3c   :  { %s641_s20 = scalar_lea.vmem %s811_s26, 256  ;;  %p646_p0 = scmp.lt.s32.totalorder %s811_s26, %s811_s26 }
  0x3d   :  { %p642_p13 = scmp.ne.s32.totalorder %s811_s26, %s641_s20  ;;  %p647_p1 = scmp.lt.s32.totalorder %s641_s20, %s641_s20 }
  0x3f   :  { %p648_p2 = por %p647_p1, %p646_p0 }
  0x41   :  { %p649_p3 = pnand %p648_p2, %p642_p13 }
  0x43   :  { %652 = shalt.err (!%p649_p3)
}
  0x44   :  { %64 = dma.hbm_to_vmem [thread:$0]  %s945_s3, 256, %s811_s26, [#allocation12], %s731_s9, %s731_s9, %s732_s10  }
  0x45   :  { %719 = dma.done.wait [#allocation6], 256  }
  0x46   :  { %720 = vsyncadd [#allocation6], 4294967040 }
  0x47   :  { %721 = dma.done.wait [#allocation9], 512  }
  0x48   :  { %722 = vsyncadd [#allocation9], 4294966784 }
  0x49   :  { %723 = dma.done.wait [#allocation12], 256  }
  0x4a   :  { %724 = vsyncadd [#allocation12], 4294967040  ;;  %vm82_vm0 = vcmask 261120   ;;  %v735_v0 = vmov 0.0   ;;  %v557_v1 = vld [vmem:[#allocation8] sm:$0xff]   ;;  %v558_v2 = vld [vmem:[#allocation8 + $0x8] sm:$0xff]  }
  0x4b   :  { %85 = vst.msk [vmem:[#allocation2 + $0x10] sm:$0xff] %vm82_vm0, %v735_v0  ;;  %83 = vst.msk [vmem:[#allocation2] sm:$0xff] %vm82_vm0, %v735_v0  ;;  %523 = vmatprep.subr.bf16.mxu0 %v557_v1  ;;  %v559_v3 = vld [vmem:[#allocation10] sm:$0xff]   ;;  %v561_v5 = vld [vmem:[#allocation5 + $0x8] sm:$0xff]   ;;  %vm370_vm1 = vcmask 257024   ;;  %s736_s3 = smov [#allocation13]  }
  0x4c   :  { %84 = vst.msk [vmem:[#allocation2 + $0x8] sm:$0xff] %vm82_vm0, %v735_v0  ;;  %86 = vst.msk [vmem:[#allocation2 + $0x18] sm:$0xff] %vm82_vm0, %v735_v0  ;;  %524 = vmatpush3.bf16.msra.mxu0 %v557_v1  ;;  %v560_v4 = vld [vmem:[#allocation5] sm:$0xff]   ;;  %531 = vmatprep.subr.bf16.mxu1 %v559_v3  ;;  %v562_v6 = vld [vmem:[#allocation11] sm:$0xff]   ;;  %s428_s21 = sshll.u32 %s736_s3, 4  ;;  %s737_s22 = smov [#allocation14]   ;;  %s429_s21 = int_to_ptr.vmem [resolvable:$true] %s428_s21 }
  0x4d   :  { %87 = vst.msk [vmem:[#allocation3] sm:$0xff] %vm82_vm0, %v735_v0  ;;  %88 = vst.msk [vmem:[#allocation3 + $0x8] sm:$0xff] %vm82_vm0, %v735_v0  ;;  %525 = vmatprep.subr.bf16.mxu0 %v558_v2  ;;  %532 = vmatpush3.bf16.msra.mxu1 %v559_v3  ;;  %v563_v7 = vld [vmem:[#allocation10 + $0x8] sm:$0xff]   ;;  %v564_v8 = vld [vmem:[#allocation11 + $0x8] sm:$0xff]   ;;  %s440_s23 = sshll.u32 %s737_s22, 4  ;;  %s653_s25 = scalar_lea.vmem %s429_s21, 256  ;;  %s883_s23 = int_to_ptr.vmem [resolvable:$true] %s440_s23 }
  0x4e   :  { %89 = vst.msk [vmem:[#allocation3 + $0x10] sm:$0xff] %vm82_vm0, %v735_v0  ;;  %90 = vst.msk [vmem:[#allocation3 + $0x18] sm:$0xff] %vm82_vm0, %v735_v0  ;;  %527 = vmatprep.mubr.msk.bf16.mxu0 %vm82_vm0, %v560_v4  ;;  %535 = vmatprep.mubr.msk.bf16.mxu1 %vm82_vm0, %v560_v4  ;;  %p654_p4 = scmp.ne.s32.totalorder %s429_s21, %s653_s25  ;;  %p658_p5 = scmp.lt.s32.totalorder %s429_s21, %s429_s21 }
  0x4f   :  { %91 = vst.msk [vmem:[#allocation4] sm:$0xff] %vm82_vm0, %v735_v0  ;;  %92 = vst.msk [vmem:[#allocation4 + $0x8] sm:$0xff] %vm82_vm0, %v735_v0  ;;  %533 = vmatprep.subr.bf16.mxu1 %v563_v7  ;;  %p659_p6 = scmp.lt.s32.totalorder %s653_s25, %s653_s25 }
  0x50   :  { %93 = vst.msk [vmem:[#allocation4 + $0x10] sm:$0xff] %vm82_vm0, %v735_v0  ;;  %94 = vst.msk [vmem:[#allocation4 + $0x18] sm:$0xff] %vm82_vm0, %v735_v0  ;;  %526 = vmatpush3.bf16.msra.mxu0 %v558_v2 }
  0x51   :  { %539 = vmatprep.subr.bf16.mxu0 %v562_v6  ;;  %534 = vmatpush3.bf16.msra.mxu1 %v563_v7  ;;  %p660_p7 = por %p659_p6, %p658_p5 }
  0x52   :  { %v101_v9 = vld [vmem:[#allocation2 + $0x10] sm:$0xff]  ;;  %v99_v10 = vld [vmem:[#allocation2] sm:$0xff] }
  0x53   :  { %528 = vmatmul.mubr.msk.bf16.vlgmr.msra.gmra.mrb[0].mxu0 %vm82_vm0, %v561_v5  ;;  %v102_v12 = vld [vmem:[#allocation2 + $0x18] sm:$0xff]  ;;  %v100_v16 = vld [vmem:[#allocation2 + $0x8] sm:$0xff]  ;;  %p661_p8 = pnand %p660_p7, %p654_p4 }
  0x54   :  { %540 = vmatpush3.bf16.msra.mxu0 %v562_v6  ;;  %543 = vmatprep.mubr.msk.bf16.mxu0 %vm82_vm0, %v560_v4  ;;  %v193_v17 = vld [vmem:[#allocation3] sm:$0xff]  ;;  %v194_v26 = vld [vmem:[#allocation3 + $0x8] sm:$0xff] }
  0x55   :  { %541 = vmatprep.subr.bf16.mxu0 %v564_v8  ;;  %536 = vmatmul.mubr.msk.bf16.vlgmr.msra.gmra.mrb[0].mxu1 %vm82_vm0, %v561_v5  ;;  %v195_v13 = vld [vmem:[#allocation3 + $0x10] sm:$0xff]  ;;  %v196_v21 = vld [vmem:[#allocation3 + $0x18] sm:$0xff] }
  0x56   :  { %v270_v34 = vld [vmem:[#allocation4] sm:$0xff]  ;;  %v271_v39 = vld [vmem:[#allocation4 + $0x8] sm:$0xff] }
  0x57   :  { %v272_v33 = vld [vmem:[#allocation4 + $0x10] sm:$0xff]  ;;  %v273_v36 = vld [vmem:[#allocation4 + $0x18] sm:$0xff] }
  0x58   :  { %542 = vmatpush3.bf16.msra.mxu0 %v564_v8 }
  0x5b   :  { %544 = vmatmul.mubr.msk.bf16.vlgmr.msra.gmra.mrb[4].mxu0 %vm82_vm0, %v561_v5 }
 0x126   :  { %v529_v11 = vpop.f32.mrb[0].mxu0 }
 0x127   :  { %v187_v14 = vadd.f32 %v529_v11, %v101_v9  ;;  %v170_v15 = vpop.f32.mrb[1].mxu0 }
 0x128   :  { %v185_v18 = vadd.f32 %v170_v15, %v99_v10  ;;  %v530_v19 = vpop.f32.mrb[2].mxu0  ;;  %v537_v20 = vpop.f32.mrb[0].mxu1 }
 0x129   :  { %191 = vst.msk [vmem:[#allocation2 + $0x10] sm:$0xff] %vm82_vm0, %v187_v14  ;;  %v188_v22 = vadd.f32 %v530_v19, %v102_v12  ;;  %v173_v23 = vpop.f32.mrb[3].mxu0  ;;  %v264_v24 = vadd.f32 %v537_v20, %v195_v13  ;;  %v247_v25 = vpop.f32.mrb[1].mxu1 }
 0x12a   :  { %189 = vst.msk [vmem:[#allocation2] sm:$0xff] %vm82_vm0, %v185_v18  ;;  %v186_v27 = vadd.f32 %v173_v23, %v100_v16  ;;  %v262_v28 = vadd.f32 %v247_v25, %v193_v17  ;;  %v538_v29 = vpop.f32.mrb[2].mxu1 }
 0x12b   :  { %192 = vst.msk [vmem:[#allocation2 + $0x18] sm:$0xff] %vm82_vm0, %v188_v22  ;;  %268 = vst.msk [vmem:[#allocation3 + $0x10] sm:$0xff] %vm82_vm0, %v264_v24  ;;  %v265_v30 = vadd.f32 %v538_v29, %v196_v21  ;;  %v250_v31 = vpop.f32.mrb[3].mxu1 }
 0x12c   :  { %190 = vst.msk [vmem:[#allocation2 + $0x8] sm:$0xff] %vm82_vm0, %v186_v27  ;;  %266 = vst.msk [vmem:[#allocation3] sm:$0xff] %vm82_vm0, %v262_v28  ;;  %v263_v32 = vadd.f32 %v250_v31, %v194_v26 }
 0x12d   :  { %269 = vst.msk [vmem:[#allocation3 + $0x18] sm:$0xff] %vm82_vm0, %v265_v30 }
 0x12e   :  { %267 = vst.msk [vmem:[#allocation3 + $0x8] sm:$0xff] %vm82_vm0, %v263_v32  ;;  %v545_v35 = vpop.f32.mrb[4].mxu0 }
 0x12f   :  { %v341_v37 = vadd.f32 %v545_v35, %v272_v33  ;;  %v324_v38 = vpop.f32.mrb[5].mxu0 }
 0x130   :  { %v339_v40 = vadd.f32 %v324_v38, %v270_v34  ;;  %v546_v41 = vpop.f32.mrb[6].mxu0  ;;  %v352_v42 = vld [vmem:[#allocation2 + $0x10] sm:$0xff] }
 0x131   :  { %345 = vst.msk [vmem:[#allocation4 + $0x10] sm:$0xff] %vm82_vm0, %v341_v37  ;;  %v342_v43 = vadd.f32 %v546_v41, %v273_v36  ;;  %v327_v44 = vpop.f32.mrb[7].mxu0  ;;  %v350_v45 = vld [vmem:[#allocation2] sm:$0xff]  ;;  %v501_v46 = vpack.c.bf16 %v352_v42, %v352_v42 }
 0x132   :  { %343 = vst.msk [vmem:[#allocation4] sm:$0xff] %vm82_vm0, %v339_v40  ;;  %v340_v47 = vadd.f32 %v327_v44, %v271_v39  ;;  %v377_v48 = vld [vmem:[#allocation3 + $0x10] sm:$0xff]  ;;  %v353_v49 = vld [vmem:[#allocation2 + $0x18] sm:$0xff]  ;;  %v499_v50 = vpack.c.bf16 %v350_v45, %v350_v45 }
 0x133   :  { %346 = vst.msk [vmem:[#allocation4 + $0x18] sm:$0xff] %vm82_vm0, %v342_v43  ;;  %v375_v51 = vld [vmem:[#allocation3] sm:$0xff]  ;;  %v505_v52 = vpack.c.bf16 %v377_v48, %v377_v48  ;;  %v351_v53 = vld [vmem:[#allocation2 + $0x8] sm:$0xff]  ;;  %v502_v54 = vpack.c.bf16 %v353_v49, %v353_v49 }
 0x134   :  { %373 = vst.msk [vmem:[#allocation13 + $0x8] sm:$0xf] %vm370_vm1, %v501_v46  ;;  %v378_v55 = vld [vmem:[#allocation3 + $0x18] sm:$0xff]  ;;  %v503_v56 = vpack.c.bf16 %v375_v51, %v375_v51  ;;  %v500_v57 = vpack.c.bf16 %v351_v53, %v351_v53  ;;  %371 = vst.msk [vmem:[#allocation13] sm:$0xf] %vm370_vm1, %v499_v50 }
 0x135   :  { %344 = vst.msk [vmem:[#allocation4 + $0x8] sm:$0xff] %vm82_vm0, %v340_v47  ;;  %v376_v58 = vld [vmem:[#allocation3 + $0x8] sm:$0xff]  ;;  %v506_v59 = vpack.c.bf16 %v378_v55, %v378_v55 }
 0x136   :  { %397 = vst.msk [vmem:[#allocation14 + $0x8] sm:$0xf] %vm370_vm1, %v505_v52  ;;  %374 = vst.msk [vmem:[#allocation13 + $0xc] sm:$0xf] %vm370_vm1, %v502_v54  ;;  %v504_v60 = vpack.c.bf16 %v376_v58, %v376_v58 }
 0x137   :  { %395 = vst.msk [vmem:[#allocation14] sm:$0xf] %vm370_vm1, %v503_v56  ;;  %372 = vst.msk [vmem:[#allocation13 + $0x4] sm:$0xf] %vm370_vm1, %v500_v57 }
 0x138   :  { %398 = vst.msk [vmem:[#allocation14 + $0xc] sm:$0xf] %vm370_vm1, %v506_v59 }
 0x139   :  { %664 = shalt.err (!%p661_p8)
}
 0x13a   :  { %s665_s28 = scalar_lea.hbm %s946_s4, 256 }
 0x13b   :  { %p666_p9 = scmp.ne.s32.totalorder %s946_s4, %s665_s28  ;;  %p669_p10 = scmp.lt.u32.totalorder %s665_s28, %s946_s4 }
 0x13d   :  { %p671_p11 = pnand %p669_p10, %p666_p9 }
 0x13f   :  { %674 = shalt.err (!%p671_p11)
}
 0x140   :  { %434 = dma.vmem_to_hbm [thread:$0]  %s429_s21, 256, %s946_s4, [#allocation7], %s731_s9, %s731_s9, %s732_s10   ;;  %396 = vst.msk [vmem:[#allocation14 + $0x4] sm:$0xf] %vm370_vm1, %v504_v60  ;;  %v401_v61 = vld [vmem:[#allocation4 + $0x10] sm:$0xff] }
 0x141   :  { %s738_s24 = smov [#allocation16]   ;;  %s675_s13 = scalar_lea.vmem %s883_s23, 256 }
 0x142   :  { %s452_s12 = sshll.u32 %s738_s24, 4  ;;  %p676_p12 = scmp.ne.s32.totalorder %s883_s23, %s675_s13  ;;  %s453_s12 = int_to_ptr.vmem [resolvable:$true] %s452_s12 }
 0x143   :  { %p680_p13 = scmp.lt.s32.totalorder %s883_s23, %s883_s23  ;;  %p681_p0 = scmp.lt.s32.totalorder %s675_s13, %s675_s13 }
 0x145   :  { %p682_p1 = por %p681_p0, %p680_p13 }
 0x147   :  { %p683_p2 = pnand %p682_p1, %p676_p12 }
 0x149   :  { %686 = shalt.err (!%p683_p2)
}
 0x14a   :  { %s687_s16 = scalar_lea.hbm %s947_s5, 256 }
 0x14b   :  { %p688_p3 = scmp.ne.s32.totalorder %s947_s5, %s687_s16  ;;  %p691_p4 = scmp.lt.u32.totalorder %s687_s16, %s947_s5 }
 0x14d   :  { %p693_p5 = pnand %p691_p4, %p688_p3 }
 0x14f   :  { %696 = shalt.err (!%p693_p5)
}
 0x150   :  { %446 = dma.vmem_to_hbm [thread:$0]  %s883_s23, 256, %s947_s5, [#allocation15], %s731_s9, %s731_s9, %s732_s10   ;;  %v399_v62 = vld [vmem:[#allocation4] sm:$0xff]  ;;  %v509_v63 = vpack.c.bf16 %v401_v61, %v401_v61  ;;  %v402_v0 = vld [vmem:[#allocation4 + $0x18] sm:$0xff]  ;;  %v400_v2 = vld [vmem:[#allocation4 + $0x8] sm:$0xff] }
 0x151   :  { %v507_v1 = vpack.c.bf16 %v399_v62, %v399_v62  ;;  %v510_v3 = vpack.c.bf16 %v402_v0, %v402_v0  ;;  %v508_v4 = vpack.c.bf16 %v400_v2, %v400_v2  ;;  %s697_s1 = scalar_lea.vmem %s453_s12, 256  ;;  %p702_p7 = scmp.lt.s32.totalorder %s453_s12, %s453_s12 }
 0x152   :  { %421 = vst.msk [vmem:[#allocation16 + $0x8] sm:$0xf] %vm370_vm1, %v509_v63  ;;  %p698_p6 = scmp.ne.s32.totalorder %s453_s12, %s697_s1  ;;  %p703_p8 = scmp.lt.s32.totalorder %s697_s1, %s697_s1 }
 0x153   :  { %419 = vst.msk [vmem:[#allocation16] sm:$0xf] %vm370_vm1, %v507_v1  ;;  %422 = vst.msk [vmem:[#allocation16 + $0xc] sm:$0xf] %vm370_vm1, %v510_v3 }
 0x154   :  { %420 = vst.msk [vmem:[#allocation16 + $0x4] sm:$0xf] %vm370_vm1, %v508_v4  ;;  %p704_p9 = por %p703_p8, %p702_p7 }
 0x156   :  { %p705_p10 = pnand %p704_p9, %p698_p6 }
 0x158   :  { %708 = shalt.err (!%p705_p10)
}
 0x159   :  { %s709_s21 = scalar_lea.hbm %s948_s6, 256 }
 0x15a   :  { %p710_p11 = scmp.ne.s32.totalorder %s948_s6, %s709_s21  ;;  %p713_p12 = scmp.lt.u32.totalorder %s709_s21, %s948_s6 }
 0x15c   :  { %p715_p13 = pnand %p713_p12, %p710_p11 }
 0x15e   :  { %718 = shalt.err (!%p715_p13)
}
 0x15f   :  { %458 = dma.vmem_to_hbm [thread:$0]  %s453_s12, 256, %s948_s6, [#allocation15], %s731_s9, %s731_s9, %s732_s10  }
 0x160   :  { %725 = dma.done.wait [#allocation7], 256  }
 0x161   :  { %726 = vsyncadd [#allocation7], 4294967040 }
 0x162   :  { %727 = dma.done.wait [#allocation15], 512  }
 0x163   :  { %728 = vsyncadd [#allocation15], 4294966784 }
 0x164   :  { %468 = vsyncpa [#allocation6], 1 }
 0x165   :  { %469 = vsyncpa [#allocation9], 1 }
 0x166   :  { %470 = vsyncpa [#allocation12], 1 }
 0x167   :  { %471 = vsyncpa [#allocation7], 1 }
 0x168   :  { %472 = vsyncpa [#allocation15], 1 }

</bundles_post_ra>
